<compile_context>
chip_gen: v6e
topology: v6e:2x2x1
jax: 0.10.0
libtpu: 0.0.40
codegen_flags: <defaults>
</compile_context>

<pallas_src>
import functools

import jax
import jax.numpy as jnp
from jax.experimental import pallas as pl
from jax.experimental.pallas import tpu as pltpu

HIDDEN1 = 400
HIDDEN2 = 300


def _round_up(n, m):
    return ((n + m - 1) // m) * m


def make_actor_kernel(max_action: float):
    """Fused 3-layer MLP: relu(l1) -> relu(l2) -> max_action * tanh(l3)."""

    def actor_kernel(x_ref, w1_ref, b1_ref, w2_ref, b2_ref, w3_ref, b3_ref, o_ref):
        # Matmul inputs bf16 (MXU-native), accumulate + elementwise in f32.
        x = x_ref[...].astype(jnp.bfloat16)
        h1 = jnp.dot(x, w1_ref[...], preferred_element_type=jnp.float32)
        h1 = jnp.maximum(h1 + b1_ref[...], 0.0)
        h2 = jnp.dot(h1.astype(jnp.bfloat16), w2_ref[...],
                     preferred_element_type=jnp.float32)
        h2 = jnp.maximum(h2 + b2_ref[...], 0.0)
        h3 = jnp.dot(h2.astype(jnp.bfloat16), w3_ref[...],
                     preferred_element_type=jnp.float32)
        o_ref[...] = (max_action * jnp.tanh(h3 + b3_ref[...])).astype(o_ref.dtype)

    return actor_kernel


def init_actor_params(key, state_dim, action_dim):
    """PyTorch nn.Linear-style uniform init, stored transposed (in, out),
    zero-padded once on the host to lane/MXU-aligned shapes.
    Weights bf16, biases f32."""
    s_pad = _round_up(state_dim, 128)
    h1_pad = _round_up(HIDDEN1, 256)   # 400 -> 512
    h2_pad = _round_up(HIDDEN2, 256)   # 300 -> 512
    a_pad = _round_up(action_dim, 128)

    k1, k2, k3, k4, k5, k6 = jax.random.split(key, 6)

    def uniform_init(k, shape, fan_in):
        bound = 1.0 / jnp.sqrt(fan_in)
        return jax.random.uniform(k, shape, jnp.float32, -bound, bound)

    def pad_to(a, shape):
        return jnp.pad(a, [(0, t - s) for s, t in zip(a.shape, shape)])

    w1 = pad_to(uniform_init(k1, (state_dim, HIDDEN1), state_dim), (s_pad, h1_pad))
    b1 = pad_to(uniform_init(k2, (1, HIDDEN1), state_dim), (1, h1_pad))
    w2 = pad_to(uniform_init(k3, (HIDDEN1, HIDDEN2), HIDDEN1), (h1_pad, h2_pad))
    b2 = pad_to(uniform_init(k4, (1, HIDDEN2), HIDDEN1), (1, h2_pad))
    w3 = pad_to(uniform_init(k5, (HIDDEN2, action_dim), HIDDEN2), (h2_pad, a_pad))
    b3 = pad_to(uniform_init(k6, (1, action_dim), HIDDEN2), (1, a_pad))

    return (w1.astype(jnp.bfloat16), b1,
            w2.astype(jnp.bfloat16), b2,
            w3.astype(jnp.bfloat16), b3)


@functools.partial(jax.jit, static_argnames=("max_action", "action_dim", "batch_tile"))
def actor_forward(x, params, max_action, action_dim, batch_tile=128):
    """Fused Actor forward.  Batch axis tiled by the grid (weights stay
    VMEM-resident across grid steps via constant index_map)."""
    w1, b1, w2, b2, w3, b3 = params
    s_pad, h1_pad = w1.shape
    h2_pad = w2.shape[1]
    a_pad = w3.shape[1]

    batch, state_dim = x.shape

    # Batch tiling: one grid step for small batches; tile batch otherwise.
    b_pad = _round_up(batch, 8)
    if b_pad <= batch_tile:
        tile_b = b_pad
    else:
        tile_b = batch_tile
        b_pad = _round_up(batch, tile_b)
    grid = (b_pad // tile_b,)

    x_p = jnp.pad(x.astype(jnp.float32),
                  ((0, b_pad - batch), (0, s_pad - state_dim)))

    flops = 2 * b_pad * (s_pad * h1_pad + h1_pad * h2_pad + h2_pad * a_pad)
    bytes_accessed = (x_p.size * 4
                      + (w1.size + w2.size + w3.size) * 2
                      + (b1.size + b2.size + b3.size) * 4
                      + b_pad * a_pad * 4)
    cost = pl.CostEstimate(flops=flops,
                           transcendentals=b_pad * a_pad,
                           bytes_accessed=bytes_accessed)

    out = pl.pallas_call(
        make_actor_kernel(float(max_action)),
        out_shape=jax.ShapeDtypeStruct((b_pad, a_pad), jnp.float32),
        grid=grid,
        in_specs=[
            pl.BlockSpec((tile_b, s_pad), lambda i: (i, 0)),    # x: tiled on batch
            pl.BlockSpec((s_pad, h1_pad), lambda i: (0, 0)),    # w1: VMEM-resident
            pl.BlockSpec((1, h1_pad), lambda i: (0, 0)),        # b1
            pl.BlockSpec((h1_pad, h2_pad), lambda i: (0, 0)),   # w2
            pl.BlockSpec((1, h2_pad), lambda i: (0, 0)),        # b2
            pl.BlockSpec((h2_pad, a_pad), lambda i: (0, 0)),    # w3
            pl.BlockSpec((1, a_pad), lambda i: (0, 0)),         # b3
        ],
        out_specs=pl.BlockSpec((tile_b, a_pad), lambda i: (i, 0)),
        compiler_params=pltpu.CompilerParams(
            dimension_semantics=("parallel",)),
        cost_estimate=cost,
    )(x_p, w1, b1, w2, b2, w3, b3)

    return out[:batch, :action_dim]


def actor_reference(x, params, max_action, action_dim, emulate_bf16=True):
    """Pure-JAX reference (bf16-emulated matmul inputs to match the kernel)."""
    w1, b1, w2, b2, w3, b3 = params
    s_pad = w1.shape[0]
    xp = jnp.pad(x.astype(jnp.float32), ((0, 0), (0, s_pad - x.shape[1])))

    def cast(a):
        return a.astype(jnp.bfloat16).astype(jnp.float32) if emulate_bf16 else a

    w1f, w2f, w3f = (w.astype(jnp.float32) for w in (w1, w2, w3))
    h1 = jnp.maximum(cast(xp) @ w1f + b1, 0.0)
    h2 = jnp.maximum(cast(h1) @ w2f + b2, 0.0)
    out = max_action * jnp.tanh(cast(h2) @ w3f + b3)
    return out[:, :action_dim]


if __name__ == "__main__":
    # MuJoCo HalfCheetah-like sizes: state_dim=17, action_dim=6.
    state_dim = 17
    action_dim = 6
    max_action = 1.0

    key = jax.random.PRNGKey(0)
    k_params, k_x1, k_x2 = jax.random.split(key, 3)
    params = init_actor_params(k_params, state_dim, action_dim)

    # Small rollout-style batch: single grid step, whole problem in VMEM.
    batch = 8
    x = jax.random.normal(k_x1, (batch, state_dim), jnp.float32)
    out = jax.block_until_ready(actor_forward(x, params, max_action, action_dim))
    assert out.shape == (batch, action_dim)
    ref = actor_reference(x, params, max_action, action_dim)
    assert jnp.allclose(out, ref, atol=1e-3, rtol=1e-3), \
        float(jnp.max(jnp.abs(out - ref)))

    # Larger batch exercising the batch-tiled grid path (weights DMA'd once,
    # ragged batch padded to the tile size, sliced back in the wrapper).
    batch2 = 300
    x2 = jax.random.normal(k_x2, (batch2, state_dim), jnp.float32)
    out2 = jax.block_until_ready(
        actor_forward(x2, params, max_action, action_dim, batch_tile=128))
    assert out2.shape == (batch2, action_dim)
    ref2 = actor_reference(x2, params, max_action, action_dim)
    assert jnp.allclose(out2, ref2, atol=1e-3, rtol=1e-3), \
        float(jnp.max(jnp.abs(out2 - ref2)))

    print("KERNEL_OK")
</pallas_src>

<mosaic_0001>
module attributes {stable_mosaic.version = 11 : i64} {
  func.func @actor_kernel(%arg0: i32, %arg1: memref<8x128xf32, #tpu.memory_space<vmem>>, %arg2: memref<128x512xbf16, #tpu.memory_space<vmem>>, %arg3: memref<1x512xf32, #tpu.memory_space<vmem>>, %arg4: memref<512x512xbf16, #tpu.memory_space<vmem>>, %arg5: memref<1x512xf32, #tpu.memory_space<vmem>>, %arg6: memref<512x128xbf16, #tpu.memory_space<vmem>>, %arg7: memref<1x128xf32, #tpu.memory_space<vmem>>, %arg8: memref<8x128xf32, #tpu.memory_space<vmem>>) attributes {dimension_semantics = [#tpu.dimension_semantics<parallel>], iteration_bounds = array<i64: 1>, scalar_prefetch = 0 : i64, scratch_operands = 0 : i64, tpu.core_type = #tpu.core_type<tc>, window_params = [{transform_indices = @transform_0, window_bounds = array<i64: 8, 128>}, {pipeline_mode = #tpu.pipeline_mode<synchronous>, transform_indices = @transform_1, window_bounds = array<i64: 128, 512>}, {pipeline_mode = #tpu.pipeline_mode<synchronous>, transform_indices = @transform_2, window_bounds = array<i64: 1, 512>}, {pipeline_mode = #tpu.pipeline_mode<synchronous>, transform_indices = @transform_3, window_bounds = array<i64: 512, 512>}, {pipeline_mode = #tpu.pipeline_mode<synchronous>, transform_indices = @transform_4, window_bounds = array<i64: 1, 512>}, {pipeline_mode = #tpu.pipeline_mode<synchronous>, transform_indices = @transform_5, window_bounds = array<i64: 512, 128>}, {pipeline_mode = #tpu.pipeline_mode<synchronous>, transform_indices = @transform_6, window_bounds = array<i64: 1, 128>}, {transform_indices = @transform_7, window_bounds = array<i64: 8, 128>}]} {
    %c0 = arith.constant 0 : index
    %c0_0 = arith.constant 0 : index
    %0 = vector.load %arg1[%c0, %c0_0] : memref<8x128xf32, #tpu.memory_space<vmem>>, vector<8x128xf32>
    %1 = arith.truncf %0 : vector<8x128xf32> to vector<8x128xbf16>
    %c0_1 = arith.constant 0 : index
    %c0_2 = arith.constant 0 : index
    %2 = vector.load %arg2[%c0_1, %c0_2] : memref<128x512xbf16, #tpu.memory_space<vmem>>, vector<128x512xbf16>
    %cst = arith.constant dense<0.000000e+00> : vector<8x512xf32>
    %3 = tpu.matmul %1, %2, %cst {dimension_numbers = #tpu.dot_dimension_numbers<[1], [0], [0], [1], [0, 0, 1, 1], [], []>} : vector<8x128xbf16>, vector<128x512xbf16>, vector<8x512xf32> -> vector<8x512xf32>
    %c0_3 = arith.constant 0 : index
    %c0_4 = arith.constant 0 : index
    %4 = vector.load %arg3[%c0_3, %c0_4] : memref<1x512xf32, #tpu.memory_space<vmem>>, vector<1x512xf32>
    %5 = vector.broadcast %4 : vector<1x512xf32> to vector<8x512xf32>
    %6 = arith.addf %3, %5 : vector<8x512xf32>
    %cst_5 = arith.constant 0.000000e+00 : f32
    %7 = vector.broadcast %cst_5 : f32 to vector<8x512xf32>
    %8 = arith.maximumf %6, %7 : vector<8x512xf32>
    %9 = arith.truncf %8 : vector<8x512xf32> to vector<8x512xbf16>
    %c0_6 = arith.constant 0 : index
    %c0_7 = arith.constant 0 : index
    %10 = vector.load %arg4[%c0_6, %c0_7] : memref<512x512xbf16, #tpu.memory_space<vmem>>, vector<512x512xbf16>
    %cst_8 = arith.constant dense<0.000000e+00> : vector<8x512xf32>
    %11 = tpu.matmul %9, %10, %cst_8 {dimension_numbers = #tpu.dot_dimension_numbers<[1], [0], [0], [1], [0, 0, 1, 1], [], []>} : vector<8x512xbf16>, vector<512x512xbf16>, vector<8x512xf32> -> vector<8x512xf32>
    %c0_9 = arith.constant 0 : index
    %c0_10 = arith.constant 0 : index
    %12 = vector.load %arg5[%c0_9, %c0_10] : memref<1x512xf32, #tpu.memory_space<vmem>>, vector<1x512xf32>
    %13 = vector.broadcast %12 : vector<1x512xf32> to vector<8x512xf32>
    %14 = arith.addf %11, %13 : vector<8x512xf32>
    %cst_11 = arith.constant 0.000000e+00 : f32
    %15 = vector.broadcast %cst_11 : f32 to vector<8x512xf32>
    %16 = arith.maximumf %14, %15 : vector<8x512xf32>
    %17 = arith.truncf %16 : vector<8x512xf32> to vector<8x512xbf16>
    %c0_12 = arith.constant 0 : index
    %c0_13 = arith.constant 0 : index
    %18 = vector.load %arg6[%c0_12, %c0_13] : memref<512x128xbf16, #tpu.memory_space<vmem>>, vector<512x128xbf16>
    %cst_14 = arith.constant dense<0.000000e+00> : vector<8x128xf32>
    %19 = tpu.matmul %17, %18, %cst_14 {dimension_numbers = #tpu.dot_dimension_numbers<[1], [0], [0], [1], [0, 0, 1, 1], [], []>} : vector<8x512xbf16>, vector<512x128xbf16>, vector<8x128xf32> -> vector<8x128xf32>
    %c0_15 = arith.constant 0 : index
    %c0_16 = arith.constant 0 : index
    %20 = vector.load %arg7[%c0_15, %c0_16] : memref<1x128xf32, #tpu.memory_space<vmem>>, vector<1x128xf32>
    %21 = vector.broadcast %20 : vector<1x128xf32> to vector<8x128xf32>
    %22 = arith.addf %19, %21 : vector<8x128xf32>
    %23 = math.tanh %22 : vector<8x128xf32>
    %cst_17 = arith.constant 1.000000e+00 : f32
    %24 = vector.broadcast %cst_17 : f32 to vector<8x128xf32>
    %25 = arith.mulf %24, %23 : vector<8x128xf32>
    %c0_18 = arith.constant 0 : index
    %c0_19 = arith.constant 0 : index
    %26 = vector.load %arg8[%c0_18, %c0_19] : memref<8x128xf32, #tpu.memory_space<vmem>>, vector<8x128xf32>
    tpu.vector_store %arg8[%c0_18, %c0_19], %25 {strides = array<i32>} : memref<8x128xf32, #tpu.memory_space<vmem>>, vector<8x128xf32>,
    return
  }
  func.func @transform_0(%arg0: i32) -> (i32, i32) {
    %c0_i32 = arith.constant 0 : i32
    %c0_i32_0 = arith.constant 0 : i32
    return %arg0, %c0_i32 : i32, i32
  }
  func.func @transform_1(%arg0: i32) -> (i32, i32) {
    %c0_i32 = arith.constant 0 : i32
    %c0_i32_0 = arith.constant 0 : i32
    %c0_i32_1 = arith.constant 0 : i32
    return %c0_i32, %c0_i32_0 : i32, i32
  }
  func.func @transform_2(%arg0: i32) -> (i32, i32) {
    %c0_i32 = arith.constant 0 : i32
    %c0_i32_0 = arith.constant 0 : i32
    %c0_i32_1 = arith.constant 0 : i32
    return %c0_i32, %c0_i32_0 : i32, i32
  }
  func.func @transform_3(%arg0: i32) -> (i32, i32) {
    %c0_i32 = arith.constant 0 : i32
    %c0_i32_0 = arith.constant 0 : i32
    %c0_i32_1 = arith.constant 0 : i32
    return %c0_i32, %c0_i32_0 : i32, i32
  }
  func.func @transform_4(%arg0: i32) -> (i32, i32) {
    %c0_i32 = arith.constant 0 : i32
    %c0_i32_0 = arith.constant 0 : i32
    %c0_i32_1 = arith.constant 0 : i32
    return %c0_i32, %c0_i32_0 : i32, i32
  }
  func.func @transform_5(%arg0: i32) -> (i32, i32) {
    %c0_i32 = arith.constant 0 : i32
    %c0_i32_0 = arith.constant 0 : i32
    %c0_i32_1 = arith.constant 0 : i32
    return %c0_i32, %c0_i32_0 : i32, i32
  }
  func.func @transform_6(%arg0: i32) -> (i32, i32) {
    %c0_i32 = arith.constant 0 : i32
    %c0_i32_0 = arith.constant 0 : i32
    %c0_i32_1 = arith.constant 0 : i32
    return %c0_i32, %c0_i32_0 : i32, i32
  }
  func.func @transform_7(%arg0: i32) -> (i32, i32) {
    %c0_i32 = arith.constant 0 : i32
    %c0_i32_0 = arith.constant 0 : i32
    return %arg0, %c0_i32 : i32, i32
  }
}

</mosaic_0001>

<bundles_post_ra>
// kernel: actor_forward.1
= control target key start
LH: loop header
LB: loop body
LE: loop exit
PB: predicated region body
PF: predicated region fallthrough
CT: control target
= control target key end

     0   :  { %12 = vsyncpa [#allocation3], 0  ;;  %s2407_s0 = inlined_call_operand.vmem [shape: f32[8,128], index: 0, kind: input, shape index: {}]   ;;  %s2408_s1 = inlined_call_operand.hbm [shape: bf16[128,512], index: 1, kind: input, shape index: {}]   ;;  %s2409_s2 = inlined_call_operand.vmem [shape: f32[1,512], index: 2, kind: input, shape index: {}]   ;;  %s2410_s3 = inlined_call_operand.hbm [shape: bf16[512,512], index: 3, kind: input, shape index: {}]   ;;  %s2411_s4 = inlined_call_operand.vmem [shape: f32[1,512], index: 4, kind: input, shape index: {}]   ;;  %s2412_s5 = inlined_call_operand.hbm [shape: bf16[512,128], index: 5, kind: input, shape index: {}]   ;;  %s2413_s6 = inlined_call_operand.vmem [shape: f32[1,128], index: 6, kind: input, shape index: {}]   ;;  %s2414_s7 = inlined_call_operand.hbm [shape: f32[8,128], index: 7, kind: output, shape index: {}]  }
   0x1   :  { %13 = vsyncpa [#allocation6], 0 }
   0x2   :  { %14 = vsyncpa [#allocation4], 0  ;;  %s2304_s24 = smov [#allocation5]   ;;  %s2305_s26 = smov [#allocation2]  }
   0x3   :  { %s36_s25 = sshll.u32 %s2304_s24, 4  ;;  %s22_s27 = sshll.u32 %s2305_s26, 4  ;;  %s37_s25 = int_to_ptr.vmem [resolvable:$true] %s36_s25  ;;  %s23_s27 = int_to_ptr.vmem [resolvable:$true] %s22_s27 }
   0x4   :  { %s2226_s28 = scalar_lea.vmem %s37_s25, 16384  ;;  %p2231_p1 = scmp.lt.s32.totalorder %s37_s25, %s37_s25 }
   0x5   :  { %p2227_p0 = scmp.ne.s32.totalorder %s37_s25, %s2226_s28  ;;  %p2232_p2 = scmp.lt.s32.totalorder %s2226_s28, %s2226_s28 }
   0x7   :  { %p2233_p3 = por %p2232_p2, %p2231_p1 }
   0x9   :  { %p2234_p4 = pnand %p2233_p3, %p2227_p0 }
   0xb   :  { %2237 = shalt.err (!%p2234_p4)
}
   0xc   :  { %s2306_s29 = smov 256   ;;  %s2307_s30 = smov 16  }
   0xd   :  { %42 = dma.hbm_to_vmem [thread:$0]  %s2410_s3, 16384, %s37_s25, [#allocation6], %s2306_s29, %s2306_s29, %s2307_s30  }
   0xe   :  { %s2246_s10 = scalar_lea.vmem %s23_s27, 4096  ;;  %p2251_p6 = scmp.lt.s32.totalorder %s23_s27, %s23_s27 }
   0xf   :  { %p2247_p5 = scmp.ne.s32.totalorder %s23_s27, %s2246_s10  ;;  %p2252_p7 = scmp.lt.s32.totalorder %s2246_s10, %s2246_s10 }
  0x11   :  { %p2253_p8 = por %p2252_p7, %p2251_p6 }
  0x13   :  { %p2254_p9 = pnand %p2253_p8, %p2247_p5 }
  0x15   :  { %2257 = shalt.err (!%p2254_p9)
}
  0x16   :  { %28 = dma.hbm_to_vmem [thread:$0]  %s2408_s1, 4096, %s23_s27, [#allocation3], %s2306_s29, %s2306_s29, %s2307_s30  }
  0x17   :  { %s2308_s13 = smov [#allocation7]  }
  0x18   :  { %s50_s14 = sshll.u32 %s2308_s13, 4  ;;  %s51_s14 = int_to_ptr.vmem [resolvable:$true] %s50_s14 }
  0x19   :  { %s2266_s15 = scalar_lea.vmem %s51_s14, 4096  ;;  %p2271_p11 = scmp.lt.s32.totalorder %s51_s14, %s51_s14 }
  0x1a   :  { %p2267_p10 = scmp.ne.s32.totalorder %s51_s14, %s2266_s15  ;;  %p2272_p12 = scmp.lt.s32.totalorder %s2266_s15, %s2266_s15 }
  0x1c   :  { %p2273_p13 = por %p2272_p12, %p2271_p11 }
  0x1e   :  { %p2274_p0 = pnand %p2273_p13, %p2267_p10 }
  0x20   :  { %2277 = shalt.err (!%p2274_p0)
}
  0x21   :  { %s2309_s3 = smov 64   ;;  %s2310_s16 = smov 4  }
  0x22   :  { %56 = dma.hbm_to_vmem [thread:$0]  %s2412_s5, 4096, %s51_s14, [#allocation6], %s2309_s3, %s2309_s3, %s2310_s16  }
  0x23   :  { %2298 = dma.done.wait [#allocation3], 4096  }
  0x24   :  { %2299 = vsyncadd [#allocation3], 4294963200 }
  0x25   :  { %2300 = dma.done.wait [#allocation6], 20480  }
  0x26   :  { %2301 = vsyncadd [#allocation6], 4294946816  ;;  %v2311_v0 = vmov 0   ;;  %v1944_v1 = vld [vmem:[#allocation2 + $0xe4] ss:$16 sps:$4 sm:$0xff]   ;;  %s2312_s22 = smov [#allocation8]  }
  0x27   :  { %317 = vmatprep.mubr.bf16.mxu0 %v2311_v0  ;;  %358 = vmatprep.mubr.bf16.mxu1 %v2311_v0  ;;  %v1946_v2 = vld [vmem:[#allocation2 + $0xec] ss:$16 sps:$4 sm:$0xff]   ;;  %v1948_v3 = vld [vmem:[#allocation2 + $0xe0] ss:$16 sps:$4 sm:$0xff]   ;;  %v1949_v4 = vld [vmem:[#allocation2 + $0xe8] ss:$16 sps:$4 sm:$0xff]  }
  0x28   :  { %285 = vmatprep.subr.bf16.mxu0 %v1944_v1  ;;  %326 = vmatprep.subr.bf16.mxu1 %v1946_v2  ;;  %v1950_v5 = vld [vmem:[#allocation2 + $0xc4] ss:$16 sps:$4 sm:$0xff]   ;;  %v1952_v6 = vld [vmem:[#allocation2 + $0xcc] ss:$16 sps:$4 sm:$0xff]   ;;  %v1954_v7 = vld [vmem:[#allocation2 + $0xc0] ss:$16 sps:$4 sm:$0xff]  }
  0x29   :  { %286 = vmatpush1.bf16.msra.mxu0 %v1948_v3  ;;  %327 = vmatpush1.bf16.msra.mxu1 %v1949_v4  ;;  %v1955_v8 = vld [vmem:[#allocation2 + $0xc8] ss:$16 sps:$4 sm:$0xff]   ;;  %v1956_v9 = vld [vmem:[#allocation2 + $0xa4] ss:$16 sps:$4 sm:$0xff]   ;;  %v1958_v10 = vld [vmem:[#allocation2 + $0xac] ss:$16 sps:$4 sm:$0xff]  }
  0x2a   :  { %287 = vmatprep.subr.bf16.mxu0 %v1950_v5  ;;  %328 = vmatprep.subr.bf16.mxu1 %v1952_v6  ;;  %v1960_v11 = vld [vmem:[#allocation2 + $0xa0] ss:$16 sps:$4 sm:$0xff]   ;;  %v1961_v12 = vld [vmem:[#allocation2 + $0xa8] ss:$16 sps:$4 sm:$0xff]   ;;  %v1962_v13 = vld [vmem:[#allocation2 + $0x84] ss:$16 sps:$4 sm:$0xff]  }
  0x2b   :  { %v1964_v14 = vld [vmem:[#allocation2 + $0x8c] ss:$16 sps:$4 sm:$0xff]   ;;  %v1966_v15 = vld [vmem:[#allocation2 + $0x80] ss:$16 sps:$4 sm:$0xff]   ;;  %v1967_v16 = vld [vmem:[#allocation2 + $0x88] ss:$16 sps:$4 sm:$0xff]  }
  0x2c   :  { %v1968_v17 = vld [vmem:[#allocation2 + $0x64] ss:$16 sps:$4 sm:$0xff]   ;;  %v1970_v18 = vld [vmem:[#allocation2 + $0x6c] ss:$16 sps:$4 sm:$0xff]   ;;  %v1972_v19 = vld [vmem:[#allocation2 + $0x60] ss:$16 sps:$4 sm:$0xff]  }
  0x2d   :  { %288 = vmatpush1.bf16.msra.mxu0 %v1954_v7  ;;  %329 = vmatpush1.bf16.msra.mxu1 %v1955_v8  ;;  %v1973_v20 = vld [vmem:[#allocation2 + $0x68] ss:$16 sps:$4 sm:$0xff]   ;;  %v1974_v21 = vld [vmem:[#allocation2 + $0x44] ss:$16 sps:$4 sm:$0xff]   ;;  %v1976_v22 = vld [vmem:[#allocation2 + $0x4c] ss:$16 sps:$4 sm:$0xff]  }
  0x2e   :  { %289 = vmatprep.subr.bf16.mxu0 %v1956_v9  ;;  %330 = vmatprep.subr.bf16.mxu1 %v1958_v10  ;;  %v1978_v23 = vld [vmem:[#allocation2 + $0x40] ss:$16 sps:$4 sm:$0xff]   ;;  %v1979_v24 = vld [vmem:[#allocation2 + $0x48] ss:$16 sps:$4 sm:$0xff]   ;;  %v1980_v25 = vld [vmem:[#allocation2 + $0x24] ss:$16 sps:$4 sm:$0xff]  }
  0x2f   :  { %v1982_v26 = vld [vmem:[#allocation2 + $0x2c] ss:$16 sps:$4 sm:$0xff]   ;;  %v1984_v27 = vld [vmem:[#allocation2 + $0x20] ss:$16 sps:$4 sm:$0xff]   ;;  %v1985_v28 = vld [vmem:[#allocation2 + $0x28] ss:$16 sps:$4 sm:$0xff]  }
  0x30   :  { %v1986_v29 = vld [vmem:[#allocation2 + $0x4] ss:$16 sps:$4 sm:$0xff]   ;;  %v1988_v30 = vld [vmem:[#allocation2 + $0xc] ss:$16 sps:$4 sm:$0xff]   ;;  %v1990_v31 = vld [vmem:[#allocation2] ss:$16 sps:$4 sm:$0xff]  }
  0x31   :  { %290 = vmatpush1.bf16.msra.mxu0 %v1960_v11  ;;  %331 = vmatpush1.bf16.msra.mxu1 %v1961_v12  ;;  %v1991_v32 = vld [vmem:[#allocation2 + $0x8] ss:$16 sps:$4 sm:$0xff]   ;;  %v69_v33 = vld [vmem:[%s2407_s0] sm:$0xff]  ;;  %s1688_s23 = sshll.u32 %s2312_s22, 4  ;;  %s1689_s23 = int_to_ptr.vmem [resolvable:$true] %s1688_s23 }
  0x32   :  { %291 = vmatprep.subr.bf16.mxu0 %v1962_v13  ;;  %332 = vmatprep.subr.bf16.mxu1 %v1964_v14  ;;  %v1994_v34 = vld [vmem:[#allocation5 + $0xe4] ss:$16 sps:$4 sm:$0xff]   ;;  %v70_v36 = vpack.c.bf16 %v69_v33, %v69_v33  ;;  %v1992_v37 = vld [vmem:[#allocation5 + $0xe0] ss:$16 sps:$4 sm:$0xff]   ;;  %s2278_s24 = scalar_lea.vmem %s1689_s23, 128  ;;  %p2283_p2 = scmp.lt.s32.totalorder %s1689_s23, %s1689_s23 }
  0x33   :  { %v1997_v35 = vld [vmem:[#allocation5 + $0x2e4] ss:$16 sps:$4 sm:$0xff]   ;;  %v1995_v38 = vld [vmem:[#allocation5 + $0x2e0] ss:$16 sps:$4 sm:$0xff]   ;;  %p2279_p1 = scmp.ne.s32.totalorder %s1689_s23, %s2278_s24  ;;  %p2284_p3 = scmp.lt.s32.totalorder %s2278_s24, %s2278_s24 }
  0x34   :  { %v2000_v39 = vld [vmem:[#allocation5 + $0xc4] ss:$16 sps:$4 sm:$0xff]   ;;  %v1998_v41 = vld [vmem:[#allocation5 + $0xc0] ss:$16 sps:$4 sm:$0xff]  }
  0x35   :  { %292 = vmatpush1.bf16.msra.mxu0 %v1966_v15  ;;  %333 = vmatpush1.bf16.msra.mxu1 %v1967_v16  ;;  %v2003_v40 = vld [vmem:[#allocation5 + $0x2c4] ss:$16 sps:$4 sm:$0xff]   ;;  %v2001_v42 = vld [vmem:[#allocation5 + $0x2c0] ss:$16 sps:$4 sm:$0xff]   ;;  %p2285_p4 = por %p2284_p3, %p2283_p2 }
  0x36   :  { %293 = vmatprep.subr.bf16.mxu0 %v1968_v17  ;;  %334 = vmatprep.subr.bf16.mxu1 %v1970_v18  ;;  %v2006_v43 = vld [vmem:[#allocation5 + $0xa4] ss:$16 sps:$4 sm:$0xff]   ;;  %v2004_v45 = vld [vmem:[#allocation5 + $0xa0] ss:$16 sps:$4 sm:$0xff]  }
  0x37   :  { %v2009_v44 = vld [vmem:[#allocation5 + $0x2a4] ss:$16 sps:$4 sm:$0xff]   ;;  %v2007_v46 = vld [vmem:[#allocation5 + $0x2a0] ss:$16 sps:$4 sm:$0xff]   ;;  %p2286_p5 = pnand %p2285_p4, %p2279_p1 }
  0x38   :  { %v2012_v47 = vld [vmem:[#allocation5 + $0x84] ss:$16 sps:$4 sm:$0xff]   ;;  %v2010_v49 = vld [vmem:[#allocation5 + $0x80] ss:$16 sps:$4 sm:$0xff]  }
  0x39   :  { %294 = vmatpush1.bf16.msra.mxu0 %v1972_v19  ;;  %335 = vmatpush1.bf16.msra.mxu1 %v1973_v20  ;;  %v2015_v48 = vld [vmem:[#allocation5 + $0x284] ss:$16 sps:$4 sm:$0xff]   ;;  %v2013_v50 = vld [vmem:[#allocation5 + $0x280] ss:$16 sps:$4 sm:$0xff]  }
  0x3a   :  { %295 = vmatprep.subr.bf16.mxu0 %v1974_v21  ;;  %336 = vmatprep.subr.bf16.mxu1 %v1976_v22  ;;  %v2018_v51 = vld [vmem:[#allocation5 + $0x64] ss:$16 sps:$4 sm:$0xff]   ;;  %v2016_v53 = vld [vmem:[#allocation5 + $0x60] ss:$16 sps:$4 sm:$0xff]  }
  0x3b   :  { %v2021_v52 = vld [vmem:[#allocation5 + $0x264] ss:$16 sps:$4 sm:$0xff]   ;;  %v2019_v54 = vld [vmem:[#allocation5 + $0x260] ss:$16 sps:$4 sm:$0xff]  }
  0x3c   :  { %v2024_v55 = vld [vmem:[#allocation5 + $0x44] ss:$16 sps:$4 sm:$0xff]   ;;  %v2022_v57 = vld [vmem:[#allocation5 + $0x40] ss:$16 sps:$4 sm:$0xff]  }
  0x3d   :  { %296 = vmatpush1.bf16.msra.mxu0 %v1978_v23  ;;  %337 = vmatpush1.bf16.msra.mxu1 %v1979_v24  ;;  %v2027_v56 = vld [vmem:[#allocation5 + $0x244] ss:$16 sps:$4 sm:$0xff]   ;;  %v2025_v58 = vld [vmem:[#allocation5 + $0x240] ss:$16 sps:$4 sm:$0xff]  }
  0x3e   :  { %297 = vmatprep.subr.bf16.mxu0 %v1980_v25  ;;  %338 = vmatprep.subr.bf16.mxu1 %v1982_v26  ;;  %v2030_v59 = vld [vmem:[#allocation5 + $0x24] ss:$16 sps:$4 sm:$0xff]   ;;  %v2028_v61 = vld [vmem:[#allocation5 + $0x20] ss:$16 sps:$4 sm:$0xff]  }
  0x3f   :  { %v2033_v60 = vld [vmem:[#allocation5 + $0x224] ss:$16 sps:$4 sm:$0xff]   ;;  %v2031_v62 = vld [vmem:[#allocation5 + $0x220] ss:$16 sps:$4 sm:$0xff]  }
  0x40   :  { %v2036_v63 = vld [vmem:[#allocation5 + $0x4] ss:$16 sps:$4 sm:$0xff]   ;;  %v2034_v1 = vld [vmem:[#allocation5] ss:$16 sps:$4 sm:$0xff]  }
  0x41   :  { %298 = vmatpush1.bf16.msra.mxu0 %v1984_v27  ;;  %339 = vmatpush1.bf16.msra.mxu1 %v1985_v28  ;;  %v2039_v0 = vld [vmem:[#allocation5 + $0x204] ss:$16 sps:$4 sm:$0xff]   ;;  %v2037_v2 = vld [vmem:[#allocation5 + $0x200] ss:$16 sps:$4 sm:$0xff]  }
  0x42   :  { %299 = vmatprep.subr.bf16.mxu0 %v1986_v29  ;;  %340 = vmatprep.subr.bf16.mxu1 %v1988_v30  ;;  %v2042_v3 = vld [vmem:[#allocation5 + $0x1e4] ss:$16 sps:$4 sm:$0xff]   ;;  %v2040_v5 = vld [vmem:[#allocation5 + $0x1e0] ss:$16 sps:$4 sm:$0xff]  }
  0x43   :  { %v2045_v4 = vld [vmem:[#allocation5 + $0x3e4] ss:$16 sps:$4 sm:$0xff]   ;;  %v2043_v6 = vld [vmem:[#allocation5 + $0x3e0] ss:$16 sps:$4 sm:$0xff]  }
  0x44   :  { %v2048_v7 = vld [vmem:[#allocation5 + $0x1c4] ss:$16 sps:$4 sm:$0xff]   ;;  %v2046_v9 = vld [vmem:[#allocation5 + $0x1c0] ss:$16 sps:$4 sm:$0xff]  }
  0x45   :  { %300 = vmatpush1.bf16.msra.mxu0 %v1990_v31  ;;  %341 = vmatpush1.bf16.msra.mxu1 %v1991_v32  ;;  %v2051_v8 = vld [vmem:[#allocation5 + $0x3c4] ss:$16 sps:$4 sm:$0xff]   ;;  %v2049_v10 = vld [vmem:[#allocation5 + $0x3c0] ss:$16 sps:$4 sm:$0xff]  }
  0x46   :  { %1165 = vmatprep.subr.bf16.mxu0 %v1994_v34  ;;  %1206 = vmatprep.subr.bf16.mxu1 %v1997_v35  ;;  %v2054_v11 = vld [vmem:[#allocation5 + $0x1a4] ss:$16 sps:$4 sm:$0xff]   ;;  %v2052_v13 = vld [vmem:[#allocation5 + $0x1a0] ss:$16 sps:$4 sm:$0xff]   ;;  %v2090_v35 = vld [vmem:[#allocation5 + $0xec] ss:$16 sps:$4 sm:$0xff]  }
  0x47   :  { %v2057_v12 = vld [vmem:[#allocation5 + $0x3a4] ss:$16 sps:$4 sm:$0xff]   ;;  %v2055_v14 = vld [vmem:[#allocation5 + $0x3a0] ss:$16 sps:$4 sm:$0xff]  }
  0x48   :  { %318 = vmatmul.mubr.bf16.vlgmr.msra.gmra.mxu0 %v70_v36  ;;  %359 = vmatmul.mubr.bf16.vlgmr.msra.gmra.mxu1 %v70_v36  ;;  %v2060_v15 = vld [vmem:[#allocation5 + $0x184] ss:$16 sps:$4 sm:$0xff]   ;;  %v2058_v17 = vld [vmem:[#allocation5 + $0x180] ss:$16 sps:$4 sm:$0xff]   ;;  %v2093_v36 = vld [vmem:[#allocation5 + $0x2ec] ss:$16 sps:$4 sm:$0xff]  }
  0x49   :  { %1166 = vmatpush1.bf16.msra.mxu0 %v1992_v37  ;;  %1207 = vmatpush1.bf16.msra.mxu1 %v1995_v38  ;;  %v2063_v16 = vld [vmem:[#allocation5 + $0x384] ss:$16 sps:$4 sm:$0xff]   ;;  %v2061_v18 = vld [vmem:[#allocation5 + $0x380] ss:$16 sps:$4 sm:$0xff]   ;;  %v105_v37 = vlaneseq }
  0x4a   :  { %1167 = vmatprep.subr.bf16.mxu0 %v2000_v39  ;;  %1208 = vmatprep.subr.bf16.mxu1 %v2003_v40  ;;  %v2066_v19 = vld [vmem:[#allocation5 + $0x164] ss:$16 sps:$4 sm:$0xff]   ;;  %v2064_v21 = vld [vmem:[#allocation5 + $0x160] ss:$16 sps:$4 sm:$0xff]  }
  0x4b   :  { %v2069_v20 = vld [vmem:[#allocation5 + $0x364] ss:$16 sps:$4 sm:$0xff]   ;;  %v2067_v22 = vld [vmem:[#allocation5 + $0x360] ss:$16 sps:$4 sm:$0xff]   ;;  %v2365_v38 = vshrl.u32 %v105_v37, 7 }
  0x4c   :  { %v2072_v23 = vld [vmem:[#allocation5 + $0x144] ss:$16 sps:$4 sm:$0xff]   ;;  %v2070_v25 = vld [vmem:[#allocation5 + $0x140] ss:$16 sps:$4 sm:$0xff]   ;;  %v2139_v37 = vld [vmem:[#allocation5 + $0x3e8] ss:$16 sps:$4 sm:$0xff]  }
  0x4d   :  { %1168 = vmatpush1.bf16.msra.mxu0 %v1998_v41  ;;  %1209 = vmatpush1.bf16.msra.mxu1 %v2001_v42  ;;  %v2075_v24 = vld [vmem:[#allocation5 + $0x344] ss:$16 sps:$4 sm:$0xff]   ;;  %v2073_v26 = vld [vmem:[#allocation5 + $0x340] ss:$16 sps:$4 sm:$0xff]   ;;  %v107_v39 = vsub.s32 0, %v2365_v38  ;;  %v115_v40 = vsub.s32 2, %v2365_v38 }
  0x4e   :  { %1169 = vmatprep.subr.bf16.mxu0 %v2006_v43  ;;  %1210 = vmatprep.subr.bf16.mxu1 %v2009_v44  ;;  %v2078_v27 = vld [vmem:[#allocation5 + $0x124] ss:$16 sps:$4 sm:$0xff]   ;;  %v2076_v29 = vld [vmem:[#allocation5 + $0x120] ss:$16 sps:$4 sm:$0xff]   ;;  %v111_v42 = vsub.s32 1, %v2365_v38  ;;  %v119_v43 = vsub.s32 3, %v2365_v38 }
  0x4f   :  { %v2081_v28 = vld [vmem:[#allocation5 + $0x324] ss:$16 sps:$4 sm:$0xff]   ;;  %v2079_v30 = vld [vmem:[#allocation5 + $0x320] ss:$16 sps:$4 sm:$0xff]  }
  0x50   :  { %v2084_v31 = vld [vmem:[#allocation5 + $0x104] ss:$16 sps:$4 sm:$0xff]   ;;  %v2082_v33 = vld [vmem:[#allocation5 + $0x100] ss:$16 sps:$4 sm:$0xff]  }
  0x51   :  { %1170 = vmatpush1.bf16.msra.mxu0 %v2004_v45  ;;  %1211 = vmatpush1.bf16.msra.mxu1 %v2007_v46  ;;  %v2087_v32 = vld [vmem:[#allocation5 + $0x304] ss:$16 sps:$4 sm:$0xff]   ;;  %v2085_v34 = vld [vmem:[#allocation5 + $0x300] ss:$16 sps:$4 sm:$0xff]  }
  0x52   :  { %1171 = vmatprep.subr.bf16.mxu0 %v2012_v47  ;;  %1212 = vmatprep.subr.bf16.mxu1 %v2015_v48  ;;  %v103_v41 = vld [vmem:[%s2409_s2] sm:$0xf] }
  0x53   :  { %v108_v44 = vrot.slane %v103_v41, %v107_v39  ;;  %v116_v45 = vrot.slane %v103_v41, %v115_v40  ;;  %v112_v46 = vrot.slane %v103_v41, %v111_v42  ;;  %v120_v47 = vrot.slane %v103_v41, %v119_v43  ;;  %v2144_v41 = vld [vmem:[#allocation5 + $0x1cc] ss:$16 sps:$4 sm:$0xff]  }
  0x55   :  { %1172 = vmatpush1.bf16.msra.mxu0 %v2010_v49  ;;  %1213 = vmatpush1.bf16.msra.mxu1 %v2013_v50 }
  0x56   :  { %1173 = vmatprep.subr.bf16.mxu0 %v2018_v51  ;;  %1214 = vmatprep.subr.bf16.mxu1 %v2021_v52 }
  0x59   :  { %1174 = vmatpush1.bf16.msra.mxu0 %v2016_v53  ;;  %1215 = vmatpush1.bf16.msra.mxu1 %v2019_v54 }
  0x5a   :  { %1175 = vmatprep.subr.bf16.mxu0 %v2024_v55  ;;  %1216 = vmatprep.subr.bf16.mxu1 %v2027_v56 }
  0x5d   :  { %1176 = vmatpush1.bf16.msra.mxu0 %v2022_v57  ;;  %1217 = vmatpush1.bf16.msra.mxu1 %v2025_v58 }
  0x5e   :  { %1177 = vmatprep.subr.bf16.mxu0 %v2030_v59  ;;  %1218 = vmatprep.subr.bf16.mxu1 %v2033_v60 }
  0x61   :  { %1178 = vmatpush1.bf16.msra.mxu0 %v2028_v61  ;;  %1219 = vmatpush1.bf16.msra.mxu1 %v2031_v62 }
  0x62   :  { %1179 = vmatprep.subr.bf16.mxu0 %v2036_v63  ;;  %1220 = vmatprep.subr.bf16.mxu1 %v2039_v0 }
  0x65   :  { %1180 = vmatpush1.bf16.msra.mxu0 %v2034_v1  ;;  %1221 = vmatpush1.bf16.msra.mxu1 %v2037_v2 }
  0x66   :  { %1181 = vmatprep.subr.bf16.mxu0 %v2042_v3  ;;  %1222 = vmatprep.subr.bf16.mxu1 %v2045_v4  ;;  %v2088_v3 = vld [vmem:[#allocation5 + $0xe8] ss:$16 sps:$4 sm:$0xff]  }
  0x67   :  { %v2091_v4 = vld [vmem:[#allocation5 + $0x2e8] ss:$16 sps:$4 sm:$0xff]  }
  0x69   :  { %1182 = vmatpush2.bf16.msra.mxu0 %v2040_v5  ;;  %1223 = vmatpush2.bf16.msra.mxu1 %v2043_v6  ;;  %v2096_v6 = vld [vmem:[#allocation5 + $0xcc] ss:$16 sps:$4 sm:$0xff]  }
  0x6a   :  { %1183 = vmatprep.subr.bf16.mxu0 %v2048_v7  ;;  %1224 = vmatprep.subr.bf16.mxu1 %v2051_v8  ;;  %v2099_v7 = vld [vmem:[#allocation5 + $0x2cc] ss:$16 sps:$4 sm:$0xff]   ;;  %v2094_v8 = vld [vmem:[#allocation5 + $0xc8] ss:$16 sps:$4 sm:$0xff]  }
  0x6d   :  { %1184 = vmatpush2.bf16.msra.mxu0 %v2046_v9  ;;  %1225 = vmatpush2.bf16.msra.mxu1 %v2049_v10  ;;  %v2097_v9 = vld [vmem:[#allocation5 + $0x2c8] ss:$16 sps:$4 sm:$0xff]   ;;  %v2102_v10 = vld [vmem:[#allocation5 + $0xac] ss:$16 sps:$4 sm:$0xff]  }
  0x6e   :  { %1185 = vmatprep.subr.bf16.mxu0 %v2054_v11  ;;  %1226 = vmatprep.subr.bf16.mxu1 %v2057_v12  ;;  %v2105_v11 = vld [vmem:[#allocation5 + $0x2ac] ss:$16 sps:$4 sm:$0xff]   ;;  %v2100_v12 = vld [vmem:[#allocation5 + $0xa8] ss:$16 sps:$4 sm:$0xff]  }
  0x71   :  { %1186 = vmatpush2.bf16.msra.mxu0 %v2052_v13  ;;  %1227 = vmatpush2.bf16.msra.mxu1 %v2055_v14  ;;  %v2103_v13 = vld [vmem:[#allocation5 + $0x2a8] ss:$16 sps:$4 sm:$0xff]   ;;  %v2108_v14 = vld [vmem:[#allocation5 + $0x8c] ss:$16 sps:$4 sm:$0xff]  }
  0x72   :  { %1187 = vmatprep.subr.bf16.mxu0 %v2060_v15  ;;  %1228 = vmatprep.subr.bf16.mxu1 %v2063_v16  ;;  %v2111_v15 = vld [vmem:[#allocation5 + $0x28c] ss:$16 sps:$4 sm:$0xff]   ;;  %v2106_v16 = vld [vmem:[#allocation5 + $0x88] ss:$16 sps:$4 sm:$0xff]  }
  0x75   :  { %1188 = vmatpush2.bf16.msra.mxu0 %v2058_v17  ;;  %1229 = vmatpush2.bf16.msra.mxu1 %v2061_v18  ;;  %v2109_v17 = vld [vmem:[#allocation5 + $0x288] ss:$16 sps:$4 sm:$0xff]   ;;  %v2114_v18 = vld [vmem:[#allocation5 + $0x6c] ss:$16 sps:$4 sm:$0xff]  }
  0x76   :  { %1189 = vmatprep.subr.bf16.mxu0 %v2066_v19  ;;  %1230 = vmatprep.subr.bf16.mxu1 %v2069_v20  ;;  %v2117_v19 = vld [vmem:[#allocation5 + $0x26c] ss:$16 sps:$4 sm:$0xff]   ;;  %v2112_v20 = vld [vmem:[#allocation5 + $0x68] ss:$16 sps:$4 sm:$0xff]  }
  0x79   :  { %1190 = vmatpush2.bf16.msra.mxu0 %v2064_v21  ;;  %1231 = vmatpush2.bf16.msra.mxu1 %v2067_v22  ;;  %v2115_v21 = vld [vmem:[#allocation5 + $0x268] ss:$16 sps:$4 sm:$0xff]   ;;  %v2120_v22 = vld [vmem:[#allocation5 + $0x4c] ss:$16 sps:$4 sm:$0xff]  }
  0x7a   :  { %1191 = vmatprep.subr.bf16.mxu0 %v2072_v23  ;;  %1232 = vmatprep.subr.bf16.mxu1 %v2075_v24  ;;  %v2123_v23 = vld [vmem:[#allocation5 + $0x24c] ss:$16 sps:$4 sm:$0xff]   ;;  %v2118_v24 = vld [vmem:[#allocation5 + $0x48] ss:$16 sps:$4 sm:$0xff]  }
  0x7d   :  { %1192 = vmatpush2.bf16.msra.mxu0 %v2070_v25  ;;  %1233 = vmatpush2.bf16.msra.mxu1 %v2073_v26  ;;  %v2121_v25 = vld [vmem:[#allocation5 + $0x248] ss:$16 sps:$4 sm:$0xff]   ;;  %v2126_v26 = vld [vmem:[#allocation5 + $0x2c] ss:$16 sps:$4 sm:$0xff]  }
  0x7e   :  { %1193 = vmatprep.subr.bf16.mxu0 %v2078_v27  ;;  %1234 = vmatprep.subr.bf16.mxu1 %v2081_v28  ;;  %v2129_v27 = vld [vmem:[#allocation5 + $0x22c] ss:$16 sps:$4 sm:$0xff]   ;;  %v2124_v28 = vld [vmem:[#allocation5 + $0x28] ss:$16 sps:$4 sm:$0xff]  }
  0x81   :  { %1194 = vmatpush2.bf16.msra.mxu0 %v2076_v29  ;;  %1235 = vmatpush2.bf16.msra.mxu1 %v2079_v30  ;;  %v2127_v29 = vld [vmem:[#allocation5 + $0x228] ss:$16 sps:$4 sm:$0xff]   ;;  %v2132_v30 = vld [vmem:[#allocation5 + $0xc] ss:$16 sps:$4 sm:$0xff]  }
  0x82   :  { %1195 = vmatprep.subr.bf16.mxu0 %v2084_v31  ;;  %1236 = vmatprep.subr.bf16.mxu1 %v2087_v32  ;;  %v2135_v31 = vld [vmem:[#allocation5 + $0x20c] ss:$16 sps:$4 sm:$0xff]   ;;  %v2130_v32 = vld [vmem:[#allocation5 + $0x8] ss:$16 sps:$4 sm:$0xff]  }
  0x85   :  { %1196 = vmatpush2.bf16.msra.mxu0 %v2082_v33  ;;  %1237 = vmatpush2.bf16.msra.mxu1 %v2085_v34  ;;  %v2133_v33 = vld [vmem:[#allocation5 + $0x208] ss:$16 sps:$4 sm:$0xff]   ;;  %v2138_v34 = vld [vmem:[#allocation5 + $0x1ec] ss:$16 sps:$4 sm:$0xff]  }
  0x86   :  { %1247 = vmatprep.subr.bf16.mxu0 %v2090_v35  ;;  %1288 = vmatprep.subr.bf16.mxu1 %v2093_v36  ;;  %v2141_v35 = vld [vmem:[#allocation5 + $0x3ec] ss:$16 sps:$4 sm:$0xff]   ;;  %v2136_v36 = vld [vmem:[#allocation5 + $0x1e8] ss:$16 sps:$4 sm:$0xff]  }
 0x108   :  { %v319_v48 = vpop.f32.mrf.mxu0  ;;  %v360_v49 = vpop.f32.mrf.mxu1 }
 0x109   :  { %v320_v50 = vadd.f32 %v319_v48, %v108_v44  ;;  %v361_v51 = vadd.f32 %v360_v49, %v116_v45  ;;  %v2147_v44 = vld [vmem:[#allocation5 + $0x3cc] ss:$16 sps:$4 sm:$0xff]   ;;  %v2142_v45 = vld [vmem:[#allocation5 + $0x1c8] ss:$16 sps:$4 sm:$0xff]  }
 0x10a   :  { %v321_v52 = vpop.f32.mrf.mxu0  ;;  %v362_v53 = vpop.f32.mrf.mxu1  ;;  %v2153_v48 = vld [vmem:[#allocation5 + $0x3ac] ss:$16 sps:$4 sm:$0xff]   ;;  %v2148_v49 = vld [vmem:[#allocation5 + $0x1a8] ss:$16 sps:$4 sm:$0xff]  }
 0x10b   :  { %v369_v54 = vmax.f32 %v361_v51, 0.0  ;;  %v322_v55 = vadd.f32 %v321_v52, %v112_v46  ;;  %v363_v56 = vadd.f32 %v362_v53, %v120_v47  ;;  %v367_v57 = vmax.f32 %v320_v50, 0.0  ;;  %v2145_v46 = vld [vmem:[#allocation5 + $0x3c8] ss:$16 sps:$4 sm:$0xff]   ;;  %v2150_v47 = vld [vmem:[#allocation5 + $0x1ac] ss:$16 sps:$4 sm:$0xff]  }
 0x10c   :  { %v323_v58 = vpop.f32.mrf.mxu0  ;;  %v364_v59 = vpop.f32.mrf.mxu1  ;;  %v2151_v50 = vld [vmem:[#allocation5 + $0x3a8] ss:$16 sps:$4 sm:$0xff]   ;;  %v2156_v51 = vld [vmem:[#allocation5 + $0x18c] ss:$16 sps:$4 sm:$0xff]  }
 0x10d   :  { %v368_v60 = vmax.f32 %v322_v55, 0.0  ;;  %v370_v61 = vmax.f32 %v363_v56, 0.0  ;;  %v2382_v62 = vpack.c.bf16 %v369_v54, %v369_v54  ;;  %v2384_v5 = vpack.c.bf16 %v367_v57, %v367_v57  ;;  %v2159_v52 = vld [vmem:[#allocation5 + $0x38c] ss:$16 sps:$4 sm:$0xff]   ;;  %v2154_v53 = vld [vmem:[#allocation5 + $0x188] ss:$16 sps:$4 sm:$0xff]  }
 0x10e   :  { %v324_v63 = vpop.f32.mrf.mxu0  ;;  %v365_v0 = vpop.f32.mrf.mxu1  ;;  %v2157_v54 = vld [vmem:[#allocation5 + $0x388] ss:$16 sps:$4 sm:$0xff]   ;;  %v2162_v55 = vld [vmem:[#allocation5 + $0x16c] ss:$16 sps:$4 sm:$0xff]  }
 0x10f   :  { %v372_v1 = vpack.c.bf16 %v368_v60, %v368_v60  ;;  %v374_v2 = vpack.c.bf16 %v370_v61, %v370_v61  ;;  %v2165_v56 = vld [vmem:[#allocation5 + $0x36c] ss:$16 sps:$4 sm:$0xff]   ;;  %v2160_v57 = vld [vmem:[#allocation5 + $0x168] ss:$16 sps:$4 sm:$0xff]  }
 0x110   :  { %v2163_v58 = vld [vmem:[#allocation5 + $0x368] ss:$16 sps:$4 sm:$0xff]   ;;  %v2168_v59 = vld [vmem:[#allocation5 + $0x14c] ss:$16 sps:$4 sm:$0xff]  }
 0x111   :  { %1197 = vmatprep.mubr.bf16.mxu0 %v372_v1  ;;  %1238 = vmatprep.mubr.bf16.mxu1 %v374_v2  ;;  %v2171_v60 = vld [vmem:[#allocation5 + $0x34c] ss:$16 sps:$4 sm:$0xff]   ;;  %v2166_v61 = vld [vmem:[#allocation5 + $0x148] ss:$16 sps:$4 sm:$0xff]  }
 0x112   :  { %1198 = vmatmul.mubr.bf16.vlgmr.msra.gmra.mxu0 %v2384_v5  ;;  %1239 = vmatmul.mubr.bf16.vlgmr.msra.gmra.mxu1 %v2382_v62  ;;  %v2169_v63 = vld [vmem:[#allocation5 + $0x348] ss:$16 sps:$4 sm:$0xff]   ;;  %v2174_v0 = vld [vmem:[#allocation5 + $0x12c] ss:$16 sps:$4 sm:$0xff]  }
 0x113   :  { %1248 = vmatpush1.bf16.msra.mxu0 %v2088_v3  ;;  %1289 = vmatpush1.bf16.msra.mxu1 %v2091_v4  ;;  %v2175_v3 = vld [vmem:[#allocation5 + $0x328] ss:$16 sps:$4 sm:$0xff]   ;;  %v2180_v4 = vld [vmem:[#allocation5 + $0x10c] ss:$16 sps:$4 sm:$0xff]  }
 0x114   :  { %1279 = vmatprep.mubr.bf16.mxu0 %v372_v1  ;;  %1320 = vmatprep.mubr.bf16.mxu1 %v374_v2  ;;  %v2177_v1 = vld [vmem:[#allocation5 + $0x32c] ss:$16 sps:$4 sm:$0xff]   ;;  %v2172_v2 = vld [vmem:[#allocation5 + $0x128] ss:$16 sps:$4 sm:$0xff]  }
 0x115   :  { %1249 = vmatprep.subr.bf16.mxu0 %v2096_v6  ;;  %1290 = vmatprep.subr.bf16.mxu1 %v2099_v7  ;;  %v2183_v6 = vld [vmem:[#allocation5 + $0x30c] ss:$16 sps:$4 sm:$0xff]   ;;  %v2178_v7 = vld [vmem:[#allocation5 + $0x108] ss:$16 sps:$4 sm:$0xff]  }
 0x117   :  { %1250 = vmatpush1.bf16.msra.mxu0 %v2094_v8  ;;  %1291 = vmatpush1.bf16.msra.mxu1 %v2097_v9  ;;  %v2181_v8 = vld [vmem:[#allocation5 + $0x308] ss:$16 sps:$4 sm:$0xff]  }
 0x118   :  { %1251 = vmatprep.subr.bf16.mxu0 %v2102_v10  ;;  %1292 = vmatprep.subr.bf16.mxu1 %v2105_v11  ;;  %v2184_v9 = vld [vmem:[#allocation7 + $0x78] sm:$0xff]   ;;  %v2186_v11 = vld [vmem:[#allocation7 + $0x70] sm:$0xff]  }
 0x119   :  { %v2185_v10 = vld [vmem:[#allocation7 + $0x38] sm:$0xff]  }
 0x11b   :  { %1252 = vmatpush1.bf16.msra.mxu0 %v2100_v12  ;;  %1293 = vmatpush1.bf16.msra.mxu1 %v2103_v13  ;;  %v2187_v12 = vld [vmem:[#allocation7 + $0x30] sm:$0xff]   ;;  %v2188_v13 = vld [vmem:[#allocation7 + $0x68] sm:$0xff]  }
 0x11c   :  { %1253 = vmatprep.subr.bf16.mxu0 %v2108_v14  ;;  %1294 = vmatprep.subr.bf16.mxu1 %v2111_v15  ;;  %v2189_v14 = vld [vmem:[#allocation7 + $0x28] sm:$0xff]   ;;  %v2190_v15 = vld [vmem:[#allocation7 + $0x60] sm:$0xff]  }
 0x11f   :  { %1254 = vmatpush1.bf16.msra.mxu0 %v2106_v16  ;;  %1295 = vmatpush1.bf16.msra.mxu1 %v2109_v17  ;;  %v2191_v16 = vld [vmem:[#allocation7 + $0x20] sm:$0xff]   ;;  %v2192_v17 = vld [vmem:[#allocation7 + $0x58] sm:$0xff]  }
 0x120   :  { %1255 = vmatprep.subr.bf16.mxu0 %v2114_v18  ;;  %1296 = vmatprep.subr.bf16.mxu1 %v2117_v19  ;;  %v2200_v18 = vld [vmem:[#allocation7 + $0xf8] sm:$0xff]  }
 0x121   :  { %v2201_v19 = vld [vmem:[#allocation7 + $0xb8] sm:$0xff]  }
 0x123   :  { %1256 = vmatpush1.bf16.msra.mxu0 %v2112_v20  ;;  %1297 = vmatpush1.bf16.msra.mxu1 %v2115_v21  ;;  %v2202_v20 = vld [vmem:[#allocation7 + $0xf0] sm:$0xff]   ;;  %v2193_v21 = vld [vmem:[#allocation7 + $0x18] sm:$0xff]  }
 0x124   :  { %1257 = vmatprep.subr.bf16.mxu0 %v2120_v22  ;;  %1298 = vmatprep.subr.bf16.mxu1 %v2123_v23  ;;  %v2204_v22 = vld [vmem:[#allocation7 + $0xe8] sm:$0xff]   ;;  %v2195_v23 = vld [vmem:[#allocation7 + $0x10] sm:$0xff]  }
 0x127   :  { %1258 = vmatpush1.bf16.msra.mxu0 %v2118_v24  ;;  %1299 = vmatpush1.bf16.msra.mxu1 %v2121_v25  ;;  %v2196_v24 = vld [vmem:[#allocation7 + $0x48] sm:$0xff]  }
 0x128   :  { %1259 = vmatprep.subr.bf16.mxu0 %v2126_v26  ;;  %1300 = vmatprep.subr.bf16.mxu1 %v2129_v27  ;;  %v2205_v25 = vld [vmem:[#allocation7 + $0xa8] sm:$0xff]   ;;  %v2206_v26 = vld [vmem:[#allocation7 + $0xe0] sm:$0xff]  }
 0x129   :  { %v2197_v27 = vld [vmem:[#allocation7 + $0x8] sm:$0xff]  }
 0x12b   :  { %1260 = vmatpush1.bf16.msra.mxu0 %v2124_v28  ;;  %1301 = vmatpush1.bf16.msra.mxu1 %v2127_v29  ;;  %v2198_v28 = vld [vmem:[#allocation7 + $0x40] sm:$0xff]  }
 0x12c   :  { %1261 = vmatprep.subr.bf16.mxu0 %v2132_v30  ;;  %1302 = vmatprep.subr.bf16.mxu1 %v2135_v31  ;;  %v2207_v29 = vld [vmem:[#allocation7 + $0xa0] sm:$0xff]   ;;  %v2208_v30 = vld [vmem:[#allocation7 + $0xd8] sm:$0xff]  }
 0x12d   :  { %v2199_v31 = vld [vmem:[#allocation7] sm:$0xff]  }
 0x12f   :  { %1262 = vmatpush1.bf16.msra.mxu0 %v2130_v32  ;;  %1303 = vmatpush1.bf16.msra.mxu1 %v2133_v33  ;;  %v2209_v32 = vld [vmem:[#allocation7 + $0x98] sm:$0xff]   ;;  %v2210_v33 = vld [vmem:[#allocation7 + $0xd0] sm:$0xff]  }
 0x130   :  { %1263 = vmatprep.subr.bf16.mxu0 %v2138_v34  ;;  %1304 = vmatprep.subr.bf16.mxu1 %v2141_v35  ;;  %v2211_v34 = vld [vmem:[#allocation7 + $0x90] sm:$0xff]   ;;  %v2212_v35 = vld [vmem:[#allocation7 + $0xc8] sm:$0xff]  }
 0x133   :  { %1264 = vmatpush2.bf16.msra.mxu0 %v2136_v36  ;;  %1305 = vmatpush2.bf16.msra.mxu1 %v2139_v37  ;;  %v2213_v36 = vld [vmem:[#allocation7 + $0x88] sm:$0xff]   ;;  %v2214_v37 = vld [vmem:[#allocation7 + $0xc0] sm:$0xff]  }
 0x134   :  { %1265 = vmatprep.subr.bf16.mxu0 %v2144_v41  ;;  %1306 = vmatprep.subr.bf16.mxu1 %v2147_v44  ;;  %v2215_v41 = vld [vmem:[#allocation7 + $0x80] sm:$0xff]  }
 0x135   :  { %v503_v44 = vld [vmem:[%s2411_s4] sm:$0xf] }
 0x137   :  { %1266 = vmatpush2.bf16.msra.mxu0 %v2142_v45  ;;  %1307 = vmatpush2.bf16.msra.mxu1 %v2145_v46  ;;  %v508_v45 = vrot.slane %v503_v44, %v107_v39  ;;  %v512_v46 = vrot.slane %v503_v44, %v111_v42  ;;  %v516_v39 = vrot.slane %v503_v44, %v115_v40 }
 0x138   :  { %1267 = vmatprep.subr.bf16.mxu0 %v2150_v47  ;;  %1308 = vmatprep.subr.bf16.mxu1 %v2153_v48  ;;  %v520_v42 = vrot.slane %v503_v44, %v119_v43 }
 0x13b   :  { %1268 = vmatpush2.bf16.msra.mxu0 %v2148_v49  ;;  %1309 = vmatpush2.bf16.msra.mxu1 %v2151_v50 }
 0x13c   :  { %1269 = vmatprep.subr.bf16.mxu0 %v2156_v51  ;;  %1310 = vmatprep.subr.bf16.mxu1 %v2159_v52 }
 0x13f   :  { %1270 = vmatpush2.bf16.msra.mxu0 %v2154_v53  ;;  %1311 = vmatpush2.bf16.msra.mxu1 %v2157_v54 }
 0x140   :  { %1271 = vmatprep.subr.bf16.mxu0 %v2162_v55  ;;  %1312 = vmatprep.subr.bf16.mxu1 %v2165_v56 }
 0x143   :  { %1272 = vmatpush2.bf16.msra.mxu0 %v2160_v57  ;;  %1313 = vmatpush2.bf16.msra.mxu1 %v2163_v58 }
 0x144   :  { %1273 = vmatprep.subr.bf16.mxu0 %v2168_v59  ;;  %1314 = vmatprep.subr.bf16.mxu1 %v2171_v60 }
 0x147   :  { %1274 = vmatpush2.bf16.msra.mxu0 %v2166_v61  ;;  %1315 = vmatpush2.bf16.msra.mxu1 %v2169_v63 }
 0x148   :  { %1275 = vmatprep.subr.bf16.mxu0 %v2174_v0  ;;  %1316 = vmatprep.subr.bf16.mxu1 %v2177_v1 }
 0x14b   :  { %1276 = vmatpush2.bf16.msra.mxu0 %v2172_v2  ;;  %1317 = vmatpush2.bf16.msra.mxu1 %v2175_v3 }
 0x14c   :  { %1277 = vmatprep.subr.bf16.mxu0 %v2180_v4  ;;  %1318 = vmatprep.subr.bf16.mxu1 %v2183_v6 }
 0x14f   :  { %1278 = vmatpush2.bf16.msra.mxu0 %v2178_v7  ;;  %1319 = vmatpush2.bf16.msra.mxu1 %v2181_v8 }
 0x150   :  { %1891 = vmatprep.subr.bf16.mxu0 %v2184_v9  ;;  %1913 = vmatprep.subr.bf16.mxu1 %v2200_v18 }
 0x152   :  { %1280 = vmatmul.mubr.bf16.vlgmr.msra.gmra.mxu0 %v2384_v5  ;;  %1321 = vmatmul.mubr.bf16.vlgmr.msra.gmra.mxu1 %v2382_v62  ;;  %v2194_v5 = vld [vmem:[#allocation7 + $0x50] sm:$0xff]  }
 0x153   :  { %1892 = vmatpush3.bf16.msra.mxu0 %v2185_v10  ;;  %1914 = vmatpush3.bf16.msra.mxu1 %v2201_v19  ;;  %v2203_v62 = vld [vmem:[#allocation7 + $0xb0] sm:$0xff]   ;;  %v1858_v19 = vld [vmem:[%s2413_s6] ss:$0 sm:$0xff] }
 0x154   :  { %1893 = vmatprep.subr.bf16.mxu0 %v2186_v11  ;;  %1915 = vmatprep.subr.bf16.mxu1 %v2202_v20 }
 0x157   :  { %1894 = vmatpush3.bf16.msra.mxu0 %v2187_v12  ;;  %1916 = vmatpush3.bf16.msra.mxu1 %v2203_v62 }
 0x158   :  { %1895 = vmatprep.subr.bf16.mxu0 %v2188_v13  ;;  %1917 = vmatprep.subr.bf16.mxu1 %v2204_v22 }
 0x15b   :  { %1896 = vmatpush3.bf16.msra.mxu0 %v2189_v14  ;;  %1918 = vmatpush3.bf16.msra.mxu1 %v2205_v25 }
 0x15c   :  { %1897 = vmatprep.subr.bf16.mxu0 %v2190_v15  ;;  %1919 = vmatprep.subr.bf16.mxu1 %v2206_v26 }
 0x15f   :  { %1898 = vmatpush3.bf16.msra.mxu0 %v2191_v16  ;;  %1920 = vmatpush3.bf16.msra.mxu1 %v2207_v29 }
 0x160   :  { %1899 = vmatprep.subr.bf16.mxu0 %v2192_v17  ;;  %1921 = vmatprep.subr.bf16.mxu1 %v2208_v30 }
 0x163   :  { %1900 = vmatpush3.bf16.msra.mxu0 %v2193_v21  ;;  %1922 = vmatpush3.bf16.msra.mxu1 %v2209_v32 }
 0x164   :  { %1901 = vmatprep.subr.bf16.mxu0 %v2194_v5  ;;  %1923 = vmatprep.subr.bf16.mxu1 %v2210_v33 }
 0x167   :  { %1902 = vmatpush3.bf16.msra.mxu0 %v2195_v23  ;;  %1924 = vmatpush3.bf16.msra.mxu1 %v2211_v34 }
 0x168   :  { %1903 = vmatprep.subr.bf16.mxu0 %v2196_v24  ;;  %1925 = vmatprep.subr.bf16.mxu1 %v2212_v35 }
 0x16b   :  { %1904 = vmatpush3.bf16.msra.mxu0 %v2197_v27  ;;  %1926 = vmatpush3.bf16.msra.mxu1 %v2213_v36 }
 0x16c   :  { %1905 = vmatprep.subr.bf16.mxu0 %v2198_v28  ;;  %1927 = vmatprep.subr.bf16.mxu1 %v2214_v37 }
 0x16f   :  { %1906 = vmatpush3.bf16.msra.mxu0 %v2199_v31  ;;  %1928 = vmatpush3.bf16.msra.mxu1 %v2215_v41 }
 0x1d2   :  { %v1199_v47 = vpop.f32.mrf.mxu0  ;;  %v1240_v48 = vpop.f32.mrf.mxu1 }
 0x1d3   :  { %v1200_v49 = vadd.f32 %v1199_v47, %v508_v45 }
 0x1d4   :  { %v1201_v50 = vpop.f32.mrf.mxu0  ;;  %v1242_v51 = vpop.f32.mrf.mxu1 }
 0x1d5   :  { %v1241_v52 = vadd.f32 %v1240_v48, %v1200_v49  ;;  %v1202_v53 = vadd.f32 %v1201_v50, %v512_v46 }
 0x1d6   :  { %v1203_v54 = vpop.f32.mrf.mxu0  ;;  %v1244_v55 = vpop.f32.mrf.mxu1 }
 0x1d7   :  { %v1243_v56 = vadd.f32 %v1242_v51, %v1202_v53  ;;  %v1329_v57 = vmax.f32 %v1241_v52, 0.0 }
 0x1d8   :  { %v1204_v58 = vpop.f32.mrf.mxu0  ;;  %v1245_v59 = vpop.f32.mrf.mxu1 }
 0x1d9   :  { %v1330_v60 = vmax.f32 %v1243_v56, 0.0  ;;  %v1333_v63 = vpack.c.bf16 %v1329_v57, %v1329_v57 }
 0x1db   :  { %v1334_v61 = vpack.c.bf16 %v1330_v60, %v1330_v60 }
 0x1dd   :  { %1632 = vmatprep.mubr.bf16.mxu0 %v1334_v61 }
 0x1de   :  { %1633 = vmatmul.mubr.bf16.vlgmr.msra.gmra.mxu0 %v1333_v63 }
 0x212   :  { %v1281_v0 = vpop.f32.mrf.mxu0  ;;  %v1322_v1 = vpop.f32.mrf.mxu1 }
 0x213   :  { %v1282_v2 = vadd.f32 %v1281_v0, %v516_v39 }
 0x214   :  { %v1283_v3 = vpop.f32.mrf.mxu0  ;;  %v1324_v4 = vpop.f32.mrf.mxu1 }
 0x215   :  { %v1323_v6 = vadd.f32 %v1322_v1, %v1282_v2  ;;  %v1284_v7 = vadd.f32 %v1283_v3, %v520_v42 }
 0x216   :  { %v1285_v8 = vpop.f32.mrf.mxu0  ;;  %v1326_v9 = vpop.f32.mrf.mxu1 }
 0x217   :  { %v1325_v10 = vadd.f32 %v1324_v4, %v1284_v7  ;;  %v1331_v11 = vmax.f32 %v1323_v6, 0.0 }
 0x218   :  { %v1286_v12 = vpop.f32.mrf.mxu0  ;;  %v1327_v13 = vpop.f32.mrf.mxu1 }
 0x219   :  { %v1332_v14 = vmax.f32 %v1325_v10, 0.0  ;;  %v1335_v16 = vpack.c.bf16 %v1331_v11, %v1331_v11 }
 0x21b   :  { %v1336_v15 = vpack.c.bf16 %v1332_v14, %v1332_v14 }
 0x21d   :  { %1672 = vmatprep.mubr.bf16.mxu1 %v1336_v15 }
 0x21e   :  { %1673 = vmatmul.mubr.bf16.vlgmr.msra.gmra.mxu1 %v1335_v16 }
 0x29e   :  { %v1907_v38 = vpop.f32.mrf.mxu0 }
 0x2a0   :  { %v1908_v40 = vpop.f32.mrf.mxu0 }
 0x2a1   :  { %v1909_v18 = vadd.f32 %v1908_v40, %v1907_v38 }
 0x2a2   :  { %v1910_v43 = vpop.f32.mrf.mxu0 }
 0x2a3   :  { %v1635_v5 = vadd.f32 %v1909_v18, %v1858_v19 }
 0x2a4   :  { %v1911_v17 = vpop.f32.mrf.mxu0 }
 0x2de   :  { %v1929_v20 = vpop.f32.mrf.mxu1 }
 0x2e0   :  { %v1930_v21 = vpop.f32.mrf.mxu1 }
 0x2e1   :  { %v1931_v62 = vadd.f32 %v1930_v21, %v1929_v20 }
 0x2e2   :  { %v1932_v22 = vpop.f32.mrf.mxu1 }
 0x2e3   :  { %v1675_v23 = vadd.f32 %v1931_v62, %v1635_v5 }
 0x2e4   :  { %v1933_v24 = vpop.f32.mrf.mxu1 }
 0x2e5   :  { %2216 = vtanh.f32 %v1675_v23 }
 0x2f2   :  { %v2217_v25 = vpop.eup %2216 }
 0x2f3   :  { %1681 = vst [vmem:[#allocation8] sm:$0xff] %v2217_v25 }
 0x2f4   :  { %2289 = shalt.err (!%p2286_p5)
}
 0x2f5   :  { %1691 = dma.vmem_to_hbm [thread:$0]  %s1689_s23, 128, %s2414_s7, [#allocation4]  }
 0x2f6   :  { %2302 = dma.done.wait [#allocation4], 128  }
 0x2f7   :  { %2303 = vsyncadd [#allocation4], 4294967168 }
 0x2f8   :  { %1695 = vsyncpa [#allocation3], 1 }
 0x2f9   :  { %1696 = vsyncpa [#allocation6], 1 }
 0x2fa   :  { %1697 = vsyncpa [#allocation4], 1 }

</bundles_post_ra>
